<compile_context>
chip_gen: v7x
topology: tpu7x:2x2x1
jax: 0.10.0
libtpu: 0.0.40
codegen_flags: <defaults>
</compile_context>

<pallas_src>
import functools

import jax
import jax.numpy as jnp
from jax.experimental import pallas as pl
from jax.experimental.pallas import tpu as pltpu

NIN, HIDDEN, NCLASS = 784, 32, 10
NIN_PAD, HID_PAD, NC_PAD = 896, 128, 128  # multiples of 128 (lane width)
NEG_INF = -1e30  # padded-class bias; exp underflows to 0 after max-shift


def _round_up(n, m):
    return -(-n // m) * m


def fcn_kernel(x_ref, w1_ref, b1_ref, w2_ref, b2_ref, out_ref):
    # x_ref:  [TB, NIN_PAD]      bf16
    # w1_ref: [NIN_PAD, HID_PAD] bf16   b1_ref: [1, HID_PAD] f32
    # w2_ref: [HID_PAD, NC_PAD]  bf16   b2_ref: [1, NC_PAD]  f32
    # out_ref:[TB, NC_PAD]       f32 softmax probabilities (padded cols == 0)
    x = x_ref[...]

    # Linear 1 + ReLU (bf16 MXU inputs, f32 accumulation, f32 VPU ops)
    h = jnp.dot(x, w1_ref[...], preferred_element_type=jnp.float32) + b1_ref[...]
    h = jnp.maximum(h, 0.0)

    # Linear 2 (padded class columns pick up the -1e30 bias -> masked out)
    logits = (
        jnp.dot(h.astype(jnp.bfloat16), w2_ref[...],
                preferred_element_type=jnp.float32)
        + b2_ref[...]
    )

    # Numerically stable softmax over the (padded, lane-dense) class axis.
    m = jnp.max(logits, axis=-1, keepdims=True)
    e = jnp.exp(logits - m)
    denom = jnp.sum(e, axis=-1, keepdims=True)
    out_ref[...] = (e * pl.reciprocal(denom, approx=True)).astype(out_ref.dtype)


def prepare_params(w1, b1, w2, b2):
    """Pad + cast parameters once (NOT per forward call).

    w1: [NIN, HIDDEN], b1: [HIDDEN], w2: [HIDDEN, NCLASS], b2: [NCLASS]
    """
    w1p = (
        jnp.zeros((NIN_PAD, HID_PAD), jnp.float32)
        .at[:NIN, :HIDDEN].set(w1.astype(jnp.float32))
        .astype(jnp.bfloat16)
    )
    b1p = jnp.zeros((1, HID_PAD), jnp.float32).at[0, :HIDDEN].set(
        b1.astype(jnp.float32))
    w2p = (
        jnp.zeros((HID_PAD, NC_PAD), jnp.float32)
        .at[:HIDDEN, :NCLASS].set(w2.astype(jnp.float32))
        .astype(jnp.bfloat16)
    )
    b2p = jnp.full((1, NC_PAD), NEG_INF, jnp.float32).at[0, :NCLASS].set(
        b2.astype(jnp.float32))
    return w1p, b1p, w2p, b2p


@functools.partial(jax.jit, static_argnames=("tb_max",))
def fcn_forward(x_nchw, w1p, b1p, w2p, b2p, *, tb_max=512):
    """x_nchw: [B, 1, 28, 28]. Returns softmax probabilities [B, NCLASS]."""
    B = x_nchw.shape[0]
    # Batch tile: multiple of 16 (bf16 sublane packing), capped for VMEM.
    TB = min(tb_max, _round_up(B, 16))
    B_pad = _round_up(B, TB)

    # nn.Flatten() + zero pad batch/feature axes (glue, not the hot path).
    x2d = x_nchw.reshape(B, -1).astype(jnp.bfloat16)
    x2d = jnp.pad(x2d, ((0, B_pad - B), (0, NIN_PAD - NIN)))

    out = pl.pallas_call(
        fcn_kernel,
        out_shape=jax.ShapeDtypeStruct((B_pad, NC_PAD), jnp.float32),
        grid=(B_pad // TB,),
        in_specs=[
            pl.BlockSpec((TB, NIN_PAD), lambda i: (i, 0)),       # x: tiled
            pl.BlockSpec((NIN_PAD, HID_PAD), lambda i: (0, 0)),  # W1: resident
            pl.BlockSpec((1, HID_PAD), lambda i: (0, 0)),        # b1: resident
            pl.BlockSpec((HID_PAD, NC_PAD), lambda i: (0, 0)),   # W2: resident
            pl.BlockSpec((1, NC_PAD), lambda i: (0, 0)),         # b2: resident
        ],
        out_specs=pl.BlockSpec((TB, NC_PAD), lambda i: (i, 0)),
        compiler_params=pltpu.CompilerParams(
            dimension_semantics=("parallel",),
        ),
    )(x2d, w1p, b1p, w2p, b2p)

    # Drop padded batch rows and padded class columns.
    return out[:B, :NCLASS]


# ---------------------------------------------------------------------------
# References
# ---------------------------------------------------------------------------
def _ref_f32(x, w1, b1, w2, b2):
    """Pure-f32 reference matching the PyTorch forward (logits=False path)."""
    x2 = x.reshape(x.shape[0], -1)
    h = jnp.maximum(x2 @ w1 + b1, 0.0)
    return jax.nn.softmax(h @ w2 + b2, axis=-1)


def _ref_matched(x, w1, b1, w2, b2):
    """Reference mirroring the kernel numerics (bf16 matmul inputs, f32 acc)."""
    x2 = x.reshape(x.shape[0], -1).astype(jnp.bfloat16)
    h = jnp.maximum(
        jnp.dot(x2, w1.astype(jnp.bfloat16), preferred_element_type=jnp.float32)
        + b1, 0.0)
    logits = (
        jnp.dot(h.astype(jnp.bfloat16), w2.astype(jnp.bfloat16),
                preferred_element_type=jnp.float32)
        + b2
    )
    return jax.nn.softmax(logits, axis=-1)


if __name__ == "__main__":
    # Module defaults: nin=784 (1x28x28), hidden=32, nclass=10. Small batch.
    B, C, H, W = 2, 1, 28, 28

    key = jax.random.PRNGKey(0)
    kx, kw1, kb1, kw2, kb2 = jax.random.split(key, 5)

    x = jax.random.normal(kx, (B, C, H, W), dtype=jnp.float32)
    w1 = jax.random.uniform(kw1, (NIN, HIDDEN), jnp.float32, -1.0, 1.0) / jnp.sqrt(NIN)
    b1 = jax.random.uniform(kb1, (HIDDEN,), jnp.float32, -1.0, 1.0) / jnp.sqrt(NIN)
    w2 = jax.random.uniform(kw2, (HIDDEN, NCLASS), jnp.float32, -1.0, 1.0) / jnp.sqrt(HIDDEN)
    b2 = jax.random.uniform(kb2, (NCLASS,), jnp.float32, -1.0, 1.0) / jnp.sqrt(HIDDEN)

    params = prepare_params(w1, b1, w2, b2)  # one-time pad + bf16 cast
    out = jax.block_until_ready(fcn_forward(x, *params))

    assert out.shape == (B, NCLASS)
    ref_m = _ref_matched(x, w1, b1, w2, b2)
    ref_f = _ref_f32(x, w1, b1, w2, b2)
    # Tight check vs the bf16-matched reference (only delta: approx reciprocal).
    assert jnp.allclose(out, ref_m, atol=2e-3, rtol=1e-3), "mismatch vs matched reference"
    # Looser check vs the pure-f32 PyTorch-equivalent reference (bf16 matmuls).
    assert jnp.allclose(out, ref_f, atol=3e-2, rtol=0.0), "mismatch vs f32 reference"
    assert jnp.allclose(jnp.sum(out, axis=-1), 1.0, atol=2e-3), "softmax rows must sum to 1"

    # TODO(synk): activations=True / logits=True / worelu / forward_active
    # variants of FCN.forward are not implemented; only the default
    # softmax(Flatten->Linear->ReLU->Linear) path is kernelized.

    print("KERNEL_OK")
</pallas_src>

<mosaic_0001>
module attributes {stable_mosaic.version = 11 : i64} {
  func.func @fcn_kernel(%arg0: i32, %arg1: memref<16x896xbf16, #tpu.memory_space<vmem>>, %arg2: memref<896x128xbf16, #tpu.memory_space<vmem>>, %arg3: memref<1x128xf32, #tpu.memory_space<vmem>>, %arg4: memref<128x128xbf16, #tpu.memory_space<vmem>>, %arg5: memref<1x128xf32, #tpu.memory_space<vmem>>, %arg6: memref<16x128xf32, #tpu.memory_space<vmem>>) attributes {dimension_semantics = [#tpu.dimension_semantics<parallel>], iteration_bounds = array<i64: 1>, scalar_prefetch = 0 : i64, scratch_operands = 0 : i64, tpu.core_type = #tpu.core_type<tc>, window_params = [{transform_indices = @transform_0, window_bounds = array<i64: 16, 896>}, {pipeline_mode = #tpu.pipeline_mode<synchronous>, transform_indices = @transform_1, window_bounds = array<i64: 896, 128>}, {pipeline_mode = #tpu.pipeline_mode<synchronous>, transform_indices = @transform_2, window_bounds = array<i64: 1, 128>}, {pipeline_mode = #tpu.pipeline_mode<synchronous>, transform_indices = @transform_3, window_bounds = array<i64: 128, 128>}, {pipeline_mode = #tpu.pipeline_mode<synchronous>, transform_indices = @transform_4, window_bounds = array<i64: 1, 128>}, {transform_indices = @transform_5, window_bounds = array<i64: 16, 128>}]} {
    %c0 = arith.constant 0 : index
    %c0_0 = arith.constant 0 : index
    %0 = vector.load %arg1[%c0, %c0_0] : memref<16x896xbf16, #tpu.memory_space<vmem>>, vector<16x896xbf16>
    %c0_1 = arith.constant 0 : index
    %c0_2 = arith.constant 0 : index
    %1 = vector.load %arg2[%c0_1, %c0_2] : memref<896x128xbf16, #tpu.memory_space<vmem>>, vector<896x128xbf16>
    %cst = arith.constant dense<0.000000e+00> : vector<16x128xf32>
    %2 = tpu.matmul %0, %1, %cst {dimension_numbers = #tpu.dot_dimension_numbers<[1], [0], [0], [1], [0, 0, 1, 1], [], []>} : vector<16x896xbf16>, vector<896x128xbf16>, vector<16x128xf32> -> vector<16x128xf32>
    %c0_3 = arith.constant 0 : index
    %c0_4 = arith.constant 0 : index
    %3 = vector.load %arg3[%c0_3, %c0_4] : memref<1x128xf32, #tpu.memory_space<vmem>>, vector<1x128xf32>
    %4 = vector.broadcast %3 : vector<1x128xf32> to vector<16x128xf32>
    %5 = arith.addf %2, %4 : vector<16x128xf32>
    %cst_5 = arith.constant 0.000000e+00 : f32
    %6 = vector.broadcast %cst_5 : f32 to vector<16x128xf32>
    %7 = arith.maximumf %5, %6 : vector<16x128xf32>
    %8 = arith.truncf %7 : vector<16x128xf32> to vector<16x128xbf16>
    %c0_6 = arith.constant 0 : index
    %c0_7 = arith.constant 0 : index
    %9 = vector.load %arg4[%c0_6, %c0_7] : memref<128x128xbf16, #tpu.memory_space<vmem>>, vector<128x128xbf16>
    %cst_8 = arith.constant dense<0.000000e+00> : vector<16x128xf32>
    %10 = tpu.matmul %8, %9, %cst_8 {dimension_numbers = #tpu.dot_dimension_numbers<[1], [0], [0], [1], [0, 0, 1, 1], [], []>} : vector<16x128xbf16>, vector<128x128xbf16>, vector<16x128xf32> -> vector<16x128xf32>
    %c0_9 = arith.constant 0 : index
    %c0_10 = arith.constant 0 : index
    %11 = vector.load %arg5[%c0_9, %c0_10] : memref<1x128xf32, #tpu.memory_space<vmem>>, vector<1x128xf32>
    %12 = vector.broadcast %11 : vector<1x128xf32> to vector<16x128xf32>
    %13 = arith.addf %10, %12 : vector<16x128xf32>
    %cst_11 = arith.constant dense<0xFF800000> : vector<16xf32>
    %14 = vector.multi_reduction <maximumf>, %13, %cst_11 [1] : vector<16x128xf32> to vector<16xf32>
    %15 = vector.shape_cast %14 : vector<16xf32> to vector<16x1xf32>
    %16 = vector.broadcast %15 : vector<16x1xf32> to vector<16x128xf32>
    %17 = arith.subf %13, %16 : vector<16x128xf32>
    %18 = math.exp %17 : vector<16x128xf32>
    %cst_12 = arith.constant dense<0.000000e+00> : vector<16xf32>
    %19 = vector.multi_reduction <add>, %18, %cst_12 [1] : vector<16x128xf32> to vector<16xf32>
    %20 = vector.shape_cast %19 : vector<16xf32> to vector<16x1xf32>
    %21 = tpu.reciprocal %20 {approx = true} : vector<16x1xf32> -> vector<16x1xf32>
    %22 = vector.broadcast %21 : vector<16x1xf32> to vector<16x128xf32>
    %23 = arith.mulf %18, %22 : vector<16x128xf32>
    %c0_13 = arith.constant 0 : index
    %c0_14 = arith.constant 0 : index
    %24 = vector.load %arg6[%c0_13, %c0_14] : memref<16x128xf32, #tpu.memory_space<vmem>>, vector<16x128xf32>
    tpu.vector_store %arg6[%c0_13, %c0_14], %23 {strides = array<i32>} : memref<16x128xf32, #tpu.memory_space<vmem>>, vector<16x128xf32>,
    return
  }
  func.func @transform_0(%arg0: i32) -> (i32, i32) {
    %c0_i32 = arith.constant 0 : i32
    %c0_i32_0 = arith.constant 0 : i32
    return %arg0, %c0_i32 : i32, i32
  }
  func.func @transform_1(%arg0: i32) -> (i32, i32) {
    %c0_i32 = arith.constant 0 : i32
    %c0_i32_0 = arith.constant 0 : i32
    %c0_i32_1 = arith.constant 0 : i32
    return %c0_i32, %c0_i32_0 : i32, i32
  }
  func.func @transform_2(%arg0: i32) -> (i32, i32) {
    %c0_i32 = arith.constant 0 : i32
    %c0_i32_0 = arith.constant 0 : i32
    %c0_i32_1 = arith.constant 0 : i32
    return %c0_i32, %c0_i32_0 : i32, i32
  }
  func.func @transform_3(%arg0: i32) -> (i32, i32) {
    %c0_i32 = arith.constant 0 : i32
    %c0_i32_0 = arith.constant 0 : i32
    %c0_i32_1 = arith.constant 0 : i32
    return %c0_i32, %c0_i32_0 : i32, i32
  }
  func.func @transform_4(%arg0: i32) -> (i32, i32) {
    %c0_i32 = arith.constant 0 : i32
    %c0_i32_0 = arith.constant 0 : i32
    %c0_i32_1 = arith.constant 0 : i32
    return %c0_i32, %c0_i32_0 : i32, i32
  }
  func.func @transform_5(%arg0: i32) -> (i32, i32) {
    %c0_i32 = arith.constant 0 : i32
    %c0_i32_0 = arith.constant 0 : i32
    return %arg0, %c0_i32 : i32, i32
  }
}

</mosaic_0001>

<bundles_post_ra>
// kernel: fcn_forward.1
= control target key start
LH: loop header
LB: loop body
LE: loop exit
PB: predicated region body
PF: predicated region fallthrough
CT: control target
= control target key end

     0   :  { %10 = vsyncpa [#allocation3], 0  ;;  %s1146_s18 = smov [#allocation2]   ;;  %s1270_s0 = inlined_call_operand.vmem [shape: bf16[16,896], index: 0, kind: input, shape index: {}]   ;;  %s1271_s1 = inlined_call_operand.hbm [shape: bf16[896,128], index: 1, kind: input, shape index: {}]   ;;  %s1272_s2 = inlined_call_operand.vmem [shape: f32[1,128], index: 2, kind: input, shape index: {}]   ;;  %s1273_s3 = inlined_call_operand.vmem [shape: bf16[128,128], index: 3, kind: input, shape index: {}]   ;;  %s1274_s4 = inlined_call_operand.vmem [shape: f32[1,128], index: 4, kind: input, shape index: {}]   ;;  %s1275_s5 = inlined_call_operand.vmem [shape: f32[16,128], index: 5, kind: output, shape index: {}]  }
   0x1   :  { %s18_s19 = sshll.u32 %s1146_s18, 4  ;;  %s1122_s22 = scalar_lea.hbm %s1271_s1, 7168  ;;  %s19_s19 = int_to_ptr.vmem [resolvable:$true] %s18_s19 }
   0x2   :  { %p1123_p0 = scmp.ne.s32.totalorder %s1271_s1, %s1122_s22  ;;  %p1126_p1 = scmp.lt.u32.totalorder %s1122_s22, %s1271_s1 }
   0x4   :  { %p1128_p2 = pnand %p1126_p1, %p1123_p0 }
   0x6   :  { %1131 = shalt.err (!%p1128_p2)
}
   0x7   :  { %s1132_s27 = scalar_lea.vmem %s19_s19, 7168  ;;  %p1137_p4 = scmp.lt.s32.totalorder %s19_s19, %s19_s19 }
   0x8   :  { %p1133_p3 = scmp.ne.s32.totalorder %s19_s19, %s1132_s27  ;;  %p1138_p5 = scmp.lt.s32.totalorder %s1132_s27, %s1132_s27 }
   0xa   :  { %p1139_p6 = por %p1138_p5, %p1137_p4 }
   0xc   :  { %p1140_p7 = pnand %p1139_p6, %p1133_p3 }
   0xe   :  { %1143 = shalt.err (!%p1140_p7)
}
   0xf   :  { %s1147_s28 = smov 64   ;;  %s1148_s29 = smov 4  }
  0x10   :  { %24 = dma.hbm_to_vmem [thread:$0]  %s1271_s1, 7168, %s19_s19, [#allocation3], %s1147_s28, %s1147_s28, %s1148_s29  }
  0x11   :  { %1144 = dma.done.wait [#allocation3], 7168  }
  0x12   :  { %1145 = vsyncadd [#allocation3], 4294960128  ;;  %v1040_v0 = vld [vmem:[#allocation2 + $0x40] sm:$0xff]   ;;  %v1044_v4 = vld [vmem:[#allocation2 + $0x48] sm:$0xff]   ;;  %v1149_v38 = vmov 0.0   ;;  %vm1150_vm0 = vmmov 0  }
  0x13   :  { %v1041_v1 = vld [vmem:[#allocation2] sm:$0xff]   ;;  %911 = vmatprep.subr.bf16.mxu0 %v1040_v0  ;;  %v1045_v5 = vld [vmem:[#allocation2 + $0x8] sm:$0xff]   ;;  %v1048_v8 = vld [vmem:[#allocation2 + $0x50] sm:$0xff]  }
  0x14   :  { %v1042_v2 = vld [vmem:[#allocation2 + $0xc0] sm:$0xff]   ;;  %912 = vmatpush3.bf16.msra.mxu0 %v1041_v1  ;;  %v1046_v6 = vld [vmem:[#allocation2 + $0xc8] sm:$0xff]   ;;  %v1049_v9 = vld [vmem:[#allocation2 + $0x10] sm:$0xff]  }
  0x15   :  { %v1043_v3 = vld [vmem:[#allocation2 + $0x80] sm:$0xff]   ;;  %933 = vmatprep.subr.bf16.mxu1 %v1042_v2  ;;  %913 = vmatprep.subr.bf16.mxu0 %v1044_v4  ;;  %v1047_v7 = vld [vmem:[#allocation2 + $0x88] sm:$0xff]   ;;  %v1050_v10 = vld [vmem:[#allocation2 + $0xd0] sm:$0xff]  }
  0x16   :  { %934 = vmatpush3.bf16.msra.mxu1 %v1043_v3  ;;  %v1051_v11 = vld [vmem:[#allocation2 + $0x90] sm:$0xff]   ;;  %v1052_v12 = vld [vmem:[#allocation2 + $0x58] sm:$0xff]   ;;  %v1056_v16 = vld [vmem:[#allocation2 + $0x60] sm:$0xff]  }
  0x17   :  { %935 = vmatprep.subr.bf16.mxu1 %v1046_v6  ;;  %v1053_v13 = vld [vmem:[#allocation2 + $0x18] sm:$0xff]   ;;  %v1057_v17 = vld [vmem:[#allocation2 + $0x20] sm:$0xff]   ;;  %v1060_v20 = vld [vmem:[#allocation2 + $0x68] sm:$0xff]  }
  0x18   :  { %914 = vmatpush3.bf16.msra.mxu0 %v1045_v5  ;;  %v1054_v14 = vld [vmem:[#allocation2 + $0xd8] sm:$0xff]   ;;  %v1058_v18 = vld [vmem:[#allocation2 + $0xe0] sm:$0xff]   ;;  %v1061_v21 = vld [vmem:[#allocation2 + $0x28] sm:$0xff]  }
  0x19   :  { %915 = vmatprep.subr.bf16.mxu0 %v1048_v8  ;;  %v1055_v15 = vld [vmem:[#allocation2 + $0x98] sm:$0xff]   ;;  %v1059_v19 = vld [vmem:[#allocation2 + $0xa0] sm:$0xff]   ;;  %v1062_v22 = vld [vmem:[#allocation2 + $0xe8] sm:$0xff]  }
  0x1a   :  { %936 = vmatpush3.bf16.msra.mxu1 %v1047_v7  ;;  %v1063_v23 = vld [vmem:[#allocation2 + $0xa8] sm:$0xff]   ;;  %v1064_v24 = vld [vmem:[#allocation2 + $0x70] sm:$0xff]   ;;  %v1068_v28 = vld [vmem:[#allocation2 + $0x78] sm:$0xff]  }
  0x1b   :  { %937 = vmatprep.subr.bf16.mxu1 %v1050_v10  ;;  %v1065_v25 = vld [vmem:[#allocation2 + $0x30] sm:$0xff]   ;;  %v1069_v29 = vld [vmem:[#allocation2 + $0x38] sm:$0xff]   ;;  %v1073_v32 = vld [vmem:[%s1270_s0 + $0x4] ss:$28 sps:$4 sm:$0xff]  }
  0x1c   :  { %916 = vmatpush3.bf16.msra.mxu0 %v1049_v9  ;;  %v1066_v26 = vld [vmem:[#allocation2 + $0xf0] sm:$0xff]   ;;  %v1070_v30 = vld [vmem:[#allocation2 + $0xf8] sm:$0xff]   ;;  %566 = vmatprep.mubr.bf16.mxu0 %v1073_v32  ;;  %v1075_v34 = vld [vmem:[#allocation2 + $0x140] sm:$0xff]  }
  0x1d   :  { %917 = vmatprep.subr.bf16.mxu0 %v1052_v12  ;;  %v1067_v27 = vld [vmem:[#allocation2 + $0xb0] sm:$0xff]   ;;  %v1071_v31 = vld [vmem:[%s1270_s0] ss:$28 sps:$4 sm:$0xff]   ;;  %v1076_v35 = vld [vmem:[%s1270_s0 + $0x8] ss:$28 sps:$4 sm:$0xff]  }
  0x1e   :  { %938 = vmatpush3.bf16.msra.mxu1 %v1051_v11  ;;  %v1074_v33 = vld [vmem:[#allocation2 + $0xb8] sm:$0xff]   ;;  %v1078_v36 = vld [vmem:[%s1270_s0 + $0xc] ss:$28 sps:$4 sm:$0xff]   ;;  %v1079_v37 = vld [vmem:[#allocation2 + $0x100] sm:$0xff]  }
  0x1f   :  { %939 = vmatprep.subr.bf16.mxu1 %v1054_v14  ;;  %607 = vmatprep.mubr.bf16.mxu1 %v1078_v36  ;;  %v1080_v39 = vld [vmem:[#allocation2 + $0x180] sm:$0xff]   ;;  %v1081_v40 = vld [vmem:[#allocation2 + $0x148] sm:$0xff]   ;;  %v1084_v43 = vld [vmem:[#allocation2 + $0x150] sm:$0xff]  }
  0x20   :  { %918 = vmatpush3.bf16.msra.mxu0 %v1053_v13  ;;  %v1082_v41 = vld [vmem:[#allocation2 + $0x108] sm:$0xff]   ;;  %v1085_v44 = vld [vmem:[#allocation2 + $0x110] sm:$0xff]   ;;  %v1087_v46 = vld [vmem:[#allocation2 + $0x158] sm:$0xff]  }
  0x21   :  { %919 = vmatprep.subr.bf16.mxu0 %v1056_v16  ;;  %v1083_v42 = vld [vmem:[#allocation2 + $0x188] sm:$0xff]   ;;  %v1086_v45 = vld [vmem:[#allocation2 + $0x190] sm:$0xff]   ;;  %v1088_v47 = vld [vmem:[#allocation2 + $0x118] sm:$0xff]  }
  0x22   :  { %940 = vmatpush3.bf16.msra.mxu1 %v1055_v15  ;;  %v1089_v48 = vld [vmem:[#allocation2 + $0x198] sm:$0xff]   ;;  %v1090_v49 = vld [vmem:[#allocation2 + $0x160] sm:$0xff]   ;;  %v1093_v52 = vld [vmem:[#allocation2 + $0x168] sm:$0xff]  }
  0x23   :  { %941 = vmatprep.subr.bf16.mxu1 %v1058_v18  ;;  %v1091_v50 = vld [vmem:[#allocation2 + $0x120] sm:$0xff]   ;;  %v1094_v53 = vld [vmem:[#allocation2 + $0x128] sm:$0xff]   ;;  %v1096_v55 = vld [vmem:[#allocation2 + $0x170] sm:$0xff]  }
  0x24   :  { %920 = vmatpush3.bf16.msra.mxu0 %v1057_v17  ;;  %v1092_v51 = vld [vmem:[#allocation2 + $0x1a0] sm:$0xff]   ;;  %v1095_v54 = vld [vmem:[#allocation2 + $0x1a8] sm:$0xff]   ;;  %v1097_v56 = vld [vmem:[#allocation2 + $0x130] sm:$0xff]  }
  0x25   :  { %921 = vmatprep.subr.bf16.mxu0 %v1060_v20  ;;  %v1098_v57 = vld [vmem:[#allocation2 + $0x1b0] sm:$0xff]   ;;  %v1099_v59 = vld [vmem:[#allocation2 + $0x178] sm:$0xff]   ;;  %v1106_v0 = vld [vmem:[%s1273_s3] sm:$0xff]  }
  0x26   :  { %942 = vmatpush3.bf16.msra.mxu1 %v1059_v19  ;;  %v1103_v58 = vld [vmem:[%s1270_s0 + $0x14] ss:$28 sps:$4 sm:$0xff]   ;;  %v1100_v60 = vld [vmem:[#allocation2 + $0x138] sm:$0xff]   ;;  %v1107_v1 = vld [vmem:[%s1273_s3 + $0x8] sm:$0xff]  }
  0x27   :  { %943 = vmatprep.subr.bf16.mxu1 %v1062_v22  ;;  %v1104_v61 = vld [vmem:[#allocation2 + $0x1b8] sm:$0xff]   ;;  %v1101_v62 = vld [vmem:[%s1270_s0 + $0x10] ss:$28 sps:$4 sm:$0xff]   ;;  %v1110_v4 = vld [vmem:[%s1273_s3 + $0x20] sm:$0xff]  }
  0x28   :  { %922 = vmatpush3.bf16.msra.mxu0 %v1061_v21  ;;  %v1105_v63 = vld [vmem:[%s1270_s0 + $0x18] ss:$28 sps:$4 sm:$0xff]   ;;  %v1111_v5 = vld [vmem:[%s1273_s3 + $0x28] sm:$0xff]   ;;  %v838_v9 = vld [vmem:[%s1272_s2] ss:$0 sm:$0xff] }
  0x29   :  { %923 = vmatprep.subr.bf16.mxu0 %v1064_v24  ;;  %v1108_v2 = vld [vmem:[%s1273_s3 + $0x10] sm:$0xff]   ;;  %v1109_v3 = vld [vmem:[%s1273_s3 + $0x18] sm:$0xff]  }
  0x2a   :  { %944 = vmatpush3.bf16.msra.mxu1 %v1063_v23  ;;  %v1112_v6 = vld [vmem:[%s1273_s3 + $0x30] sm:$0xff]   ;;  %v1113_v7 = vld [vmem:[%s1273_s3 + $0x38] sm:$0xff]  }
  0x2b   :  { %945 = vmatprep.subr.bf16.mxu1 %v1066_v26 }
  0x2c   :  { %924 = vmatpush3.bf16.msra.mxu0 %v1065_v25 }
  0x2d   :  { %925 = vmatprep.subr.bf16.mxu0 %v1068_v28 }
  0x2e   :  { %946 = vmatpush3.bf16.msra.mxu1 %v1067_v27 }
  0x2f   :  { %947 = vmatprep.subr.bf16.mxu1 %v1070_v30 }
  0x30   :  { %926 = vmatpush3.bf16.msra.mxu0 %v1069_v29 }
  0x31   :  { %955 = vmatprep.subr.bf16.mxu0 %v1075_v34 }
  0x32   :  { %948 = vmatpush3.bf16.msra.mxu1 %v1074_v33 }
  0x33   :  { %567 = vmatmul.mubr.bf16.vlgmr.msra.gmra.mrb[0].mxu0 %v1071_v31  ;;  %995 = vmatprep.subr.bf16.mxu1 %v1149_v38 }
  0x34   :  { %956 = vmatpush3.bf16.msra.mxu0 %v1079_v37  ;;  %648 = vmatprep.mubr.bf16.mxu0 %v1103_v58 }
  0x35   :  { %608 = vmatmul.mubr.bf16.vlgmr.msra.gmra.mrb[0].mxu1 %v1076_v35  ;;  %957 = vmatprep.subr.bf16.mxu0 %v1081_v40 }
  0x36   :  { %996 = vmatpush3.bf16.msra.mxu1 %v1080_v39  ;;  %1011 = vmatprep.mubr.msk.bf16.mxu1 %vm1150_vm0, %v1149_v38 }
  0x37   :  { %997 = vmatprep.subr.bf16.mxu1 %v1149_v38 }
  0x38   :  { %958 = vmatpush3.bf16.msra.mxu0 %v1082_v41 }
  0x39   :  { %959 = vmatprep.subr.bf16.mxu0 %v1084_v43 }
  0x3a   :  { %998 = vmatpush3.bf16.msra.mxu1 %v1083_v42  ;;  %v902_v42 = vld [vmem:[%s1274_s4] ss:$0 sm:$0xff] }
  0x3b   :  { %999 = vmatprep.subr.bf16.mxu1 %v1149_v38 }
  0x3c   :  { %960 = vmatpush3.bf16.msra.mxu0 %v1085_v44 }
  0x3d   :  { %961 = vmatprep.subr.bf16.mxu0 %v1087_v46 }
  0x3e   :  { %1000 = vmatpush3.bf16.msra.mxu1 %v1086_v45 }
  0x3f   :  { %1001 = vmatprep.subr.bf16.mxu1 %v1149_v38 }
  0x40   :  { %962 = vmatpush3.bf16.msra.mxu0 %v1088_v47 }
  0x41   :  { %963 = vmatprep.subr.bf16.mxu0 %v1090_v49 }
  0x42   :  { %1002 = vmatpush3.bf16.msra.mxu1 %v1089_v48 }
  0x43   :  { %1003 = vmatprep.subr.bf16.mxu1 %v1149_v38 }
  0x44   :  { %964 = vmatpush3.bf16.msra.mxu0 %v1091_v50 }
  0x45   :  { %965 = vmatprep.subr.bf16.mxu0 %v1093_v52 }
  0x46   :  { %1004 = vmatpush3.bf16.msra.mxu1 %v1092_v51 }
  0x47   :  { %1005 = vmatprep.subr.bf16.mxu1 %v1149_v38 }
  0x48   :  { %966 = vmatpush3.bf16.msra.mxu0 %v1094_v53 }
  0x49   :  { %967 = vmatprep.subr.bf16.mxu0 %v1096_v55 }
  0x4a   :  { %1006 = vmatpush3.bf16.msra.mxu1 %v1095_v54 }
  0x4b   :  { %1007 = vmatprep.subr.bf16.mxu1 %v1149_v38 }
  0x4c   :  { %968 = vmatpush3.bf16.msra.mxu0 %v1097_v56 }
  0x4d   :  { %969 = vmatprep.subr.bf16.mxu0 %v1099_v59 }
  0x4e   :  { %1008 = vmatpush3.bf16.msra.mxu1 %v1098_v57 }
  0x4f   :  { %1009 = vmatprep.subr.bf16.mxu1 %v1149_v38 }
  0x50   :  { %970 = vmatpush3.bf16.msra.mxu0 %v1100_v60 }
  0x51   :  { %1015 = vmatprep.subr.bf16.mxu0 %v1149_v38 }
  0x52   :  { %1010 = vmatpush3.bf16.msra.mxu1 %v1104_v61 }
  0x53   :  { %649 = vmatmul.mubr.bf16.vlgmr.msra.gmra.mrb[4].mxu0 %v1101_v62 }
  0x54   :  { %1031 = vmatprep.mubr.msk.bf16.mxu0 %vm1150_vm0, %v1149_v38  ;;  %1016 = vmatpush3.bf16.msra.mxu0 %v1106_v0 }
  0x55   :  { %1012 = vmatmul.mubr.bf16.vlgmr.msra.gmra.mrb[4].mxu1 %v1105_v63  ;;  %1017 = vmatprep.subr.bf16.mxu0 %v1149_v38 }
  0x58   :  { %1018 = vmatpush3.bf16.msra.mxu0 %v1107_v1 }
  0x59   :  { %1019 = vmatprep.subr.bf16.mxu0 %v1149_v38 }
  0x5c   :  { %1020 = vmatpush3.bf16.msra.mxu0 %v1108_v2 }
  0x5d   :  { %1021 = vmatprep.subr.bf16.mxu0 %v1149_v38 }
  0x60   :  { %1022 = vmatpush3.bf16.msra.mxu0 %v1109_v3 }
  0x61   :  { %1023 = vmatprep.subr.bf16.mxu0 %v1149_v38 }
  0x64   :  { %1024 = vmatpush3.bf16.msra.mxu0 %v1110_v4 }
  0x65   :  { %1025 = vmatprep.subr.bf16.mxu0 %v1149_v38 }
  0x68   :  { %1026 = vmatpush3.bf16.msra.mxu0 %v1111_v5 }
  0x69   :  { %1027 = vmatprep.subr.bf16.mxu0 %v1149_v38 }
  0x6c   :  { %1028 = vmatpush3.bf16.msra.mxu0 %v1112_v6 }
  0x6d   :  { %1029 = vmatprep.subr.bf16.mxu0 %v1149_v38 }
  0x70   :  { %1030 = vmatpush3.bf16.msra.mxu0 %v1113_v7 }
 0x106   :  { %v927_v8 = vpop.f32.mrb[0].mxu0 }
 0x107   :  { %v928_v10 = vpop.f32.mrb[1].mxu0 }
 0x108   :  { %v929_v11 = vadd.f32 %v928_v10, %v927_v8  ;;  %v930_v12 = vpop.f32.mrb[2].mxu0  ;;  %v949_v13 = vpop.f32.mrb[0].mxu1 }
 0x109   :  { %v931_v14 = vpop.f32.mrb[3].mxu0  ;;  %v950_v17 = vpop.f32.mrb[1].mxu1 }
 0x10a   :  { %v569_v15 = vadd.f32 %v929_v11, %v838_v9  ;;  %v932_v16 = vadd.f32 %v931_v14, %v930_v12  ;;  %v951_v18 = vadd.f32 %v950_v17, %v949_v13  ;;  %v952_v19 = vpop.f32.mrb[2].mxu1 }
 0x10b   :  { %v953_v21 = vpop.f32.mrb[3].mxu1 }
 0x10c   :  { %v572_v20 = vadd.f32 %v932_v16, %v838_v9  ;;  %v610_v22 = vadd.f32 %v951_v18, %v569_v15  ;;  %v954_v23 = vadd.f32 %v953_v21, %v952_v19 }
 0x10e   :  { %v613_v24 = vadd.f32 %v954_v23, %v572_v20 }
 0x126   :  { %v971_v25 = vpop.f32.mrb[4].mxu0 }
 0x127   :  { %v972_v26 = vpop.f32.mrb[5].mxu0 }
 0x128   :  { %v691_v27 = vpop.f32.mrb[4].mxu1  ;;  %v973_v28 = vadd.f32 %v972_v26, %v971_v25  ;;  %v974_v29 = vpop.f32.mrb[6].mxu0 }
 0x129   :  { %v1013_v30 = vpop.f32.mrb[5].mxu1  ;;  %v975_v31 = vpop.f32.mrb[7].mxu0 }
 0x12a   :  { %v694_v32 = vpop.f32.mrb[6].mxu1  ;;  %v651_v33 = vadd.f32 %v973_v28, %v610_v22  ;;  %v976_v34 = vadd.f32 %v975_v31, %v974_v29 }
 0x12b   :  { %v1014_v35 = vpop.f32.mrb[7].mxu1 }
 0x12c   :  { %v692_v36 = vadd.f32 %v691_v27, %v651_v33  ;;  %v654_v37 = vadd.f32 %v976_v34, %v613_v24 }
 0x12e   :  { %v695_v38 = vadd.f32 %v694_v32, %v654_v37  ;;  %v698_v39 = vmax.f32 %v692_v36, 0.0 }
 0x130   :  { %v699_v40 = vmax.f32 %v695_v38, 0.0 }
 0x132   :  { %v700_v41 = vpack.c.bf16 %v699_v40, %v698_v39 }
 0x134   :  { %1032 = vmatmul.mubr.bf16.vlgmr.msra.gmra.mrb[8].mxu0 %v700_v41 }
 0x207   :  { %v806_v43 = vpop.f32.mrb[8].mxu0 }
 0x208   :  { %v807_v44 = vadd.f32 %v902_v42, %v806_v43  ;;  %v1033_v45 = vpop.f32.mrb[9].mxu0 }
 0x209   :  { %v809_v46 = vpop.f32.mrb[10].mxu0 }
 0x20a   :  { %813 = vmax.xlane.f32.xlu0 %v807_v44  ;;  %v1034_v47 = vpop.f32.mrb[11].mxu0  ;;  %v810_v48 = vadd.f32 %v902_v42, %v809_v46 }
 0x20e   :  { %815 = vmax.xlane.f32.xlu0 %v810_v48 }
 0x297   :  { %v814_v49 = vpop.xlane.xlu0 %813 }
 0x298   :  { %v817_v50 = vsub.f32 %v807_v44, %v814_v49 }
 0x29a   :  { %v819_v51 = vmul.f32 1.442695, %v817_v50 }
 0x29b   :  { %v816_v52 = vpop.xlane.xlu0 %815 }
 0x29c   :  { %1114 = vpow2.f32 %v819_v51  ;;  %v818_v53 = vsub.f32 %v810_v48, %v816_v52 }
 0x29e   :  { %v821_v54 = vmul.f32 1.442695, %v818_v53 }
 0x2a0   :  { %1116 = vpow2.f32 %v821_v54 }
 0x2a6   :  { %v1115_v55 = vpop.eup %1114 }
 0x2a7   :  { %823 = vadd.xlane.f32.xlu1 %v1115_v55 }
 0x2aa   :  { %v1117_v56 = vpop.eup %1116 }
 0x2ab   :  { %825 = vadd.xlane.f32.xlu1 %v1117_v56 }
 0x334   :  { %v824_v57 = vpop.xlane.xlu1 %823 }
 0x335   :  { %1118 = vrcp.f32 %v824_v57 }
 0x338   :  { %v826_v58 = vpop.xlane.xlu1 %825 }
 0x339   :  { %1120 = vrcp.f32 %v826_v58 }
 0x33f   :  { %v1119_v59 = vpop.eup %1118 }
 0x340   :  { %v829_v60 = vmul.f32 %v1119_v59, %v1115_v55 }
 0x342   :  { %831 = vst [vmem:[%s1275_s5] sm:$0xff] %v829_v60 }
 0x343   :  { %v1121_v61 = vpop.eup %1120 }
 0x344   :  { %v830_v62 = vmul.f32 %v1121_v61, %v1117_v56 }
 0x346   :  { %832 = vst [vmem:[%s1275_s5 + $0x8] sm:$0xff] %v830_v62 }
 0x347   :  { %837 = vsyncpa [#allocation3], 1 }

</bundles_post_ra>
